<compile_context>
chip_gen: v7x
topology: tpu7x:2x2x1
jax: 0.10.0
libtpu: 0.0.40
codegen_flags: <defaults>
</compile_context>

<pallas_src>
import jax
import jax.numpy as jnp
from jax.experimental import pallas as pl
from jax.experimental.pallas import tpu as pltpu

# Embedding widths implied by the nn.Sequential head: 16 + 32 + 128*3 = 432
L_DIM = 16           # ligandgnn (AttentiveFP out_channels=16)
C_DIM = 32           # heterognn output
P_DIM = 128 * 3      # ProteinMultimodalNetwork output (3 modalities x 128)
IN_DIM = L_DIM + C_DIM + P_DIM   # 432
H1 = 256
H2 = 128
OUT = 1              # true output width
OUT_PAD = 128        # lane-dense padded output width (column 0 is the result)


def _round_up(x, m):
    return (x + m - 1) // m * m


def _mlp_head_kernel(l_ref, c_ref, p_ref,
                     w1l_ref, w1c_ref, w1p_ref, b1_ref,
                     w2_ref, b2_ref, w3_ref, b3_ref,
                     o_ref):
    """Fused 3-layer MLP head; dropout = identity at inference."""
    # ---- layer 1: split-K matmul (replaces the 432-wide concat) ----
    l = l_ref[...].astype(jnp.bfloat16)          # (TB, 16)
    c = c_ref[...].astype(jnp.bfloat16)          # (TB, 32)
    p = p_ref[...].astype(jnp.bfloat16)          # (TB, 384)
    h1 = jnp.dot(p, w1p_ref[...], preferred_element_type=jnp.float32)
    h1 = h1 + jnp.dot(c, w1c_ref[...], preferred_element_type=jnp.float32)
    h1 = h1 + jnp.dot(l, w1l_ref[...], preferred_element_type=jnp.float32)
    h1 = jnp.maximum(h1 + b1_ref[...], 0.0).astype(jnp.bfloat16)   # (TB, 256)
    # ---- layer 2 ----
    h2 = jnp.dot(h1, w2_ref[...], preferred_element_type=jnp.float32)
    h2 = jnp.maximum(h2 + b2_ref[...], 0.0).astype(jnp.bfloat16)   # (TB, 128)
    # ---- layer 3 (N padded 1 -> 128 so the store is lane-dense) ----
    y = jnp.dot(h2, w3_ref[...], preferred_element_type=jnp.float32)
    y = jnp.maximum(y + b3_ref[...], 0.0)                          # (TB, 128)
    o_ref[...] = y.astype(o_ref.dtype)


def init_params(key):
    """Deterministic init mirroring the shapes of self.out in LBAPredictor."""
    k1, k2, k3, k4, k5, k6 = jax.random.split(key, 6)

    def lin(kw, kb, fan_in, fan_out):
        bound = 1.0 / jnp.sqrt(fan_in)
        w = jax.random.uniform(kw, (fan_in, fan_out), jnp.float32, -bound, bound)
        b = jax.random.uniform(kb, (1, fan_out), jnp.float32, -bound, bound)
        return w, b

    w1, b1 = lin(k1, k2, IN_DIM, H1)
    w2, b2 = lin(k3, k4, H1, H2)
    w3, b3 = lin(k5, k6, H2, OUT)
    return {"w1": w1, "b1": b1, "w2": w2, "b2": b2, "w3": w3, "b3": b3}


def prepare_head_params(params):
    """One-time repack: bf16 weights, split w1 rows, pad layer-3 to 128 lanes."""
    w1 = params["w1"].astype(jnp.bfloat16)
    w3p = jnp.zeros((H2, OUT_PAD), jnp.float32).at[:, :OUT].set(params["w3"])
    b3p = jnp.zeros((1, OUT_PAD), jnp.float32).at[:, :OUT].set(params["b3"])
    return {
        "w1l": w1[:L_DIM],                         # (16, 256) bf16
        "w1c": w1[L_DIM:L_DIM + C_DIM],            # (32, 256) bf16
        "w1p": w1[L_DIM + C_DIM:],                 # (384, 256) bf16
        "b1": params["b1"],                        # (1, 256) f32
        "w2": params["w2"].astype(jnp.bfloat16),   # (256, 128) bf16
        "b2": params["b2"],                        # (1, 128) f32
        "w3": w3p.astype(jnp.bfloat16),            # (128, 128) bf16 (padded)
        "b3": b3p,                                 # (1, 128) f32 (padded)
    }


def mlp_head(l_emb, c_emb, p_emb, prepared, *, block_b=256):
    """(B,16),(B,32),(B,384) f32 -> (B,) f32 via one batch-tiled Pallas call."""
    B = l_emb.shape[0]
    TB = min(block_b, _round_up(B, 8))
    Bp = _round_up(B, TB)
    if Bp != B:
        pad = ((0, Bp - B), (0, 0))
        l_emb = jnp.pad(l_emb, pad)
        c_emb = jnp.pad(c_emb, pad)
        p_emb = jnp.pad(p_emb, pad)
    grid = (Bp // TB,)

    def batch_spec(feat):
        return pl.BlockSpec((TB, feat), lambda i: (i, 0))

    def const_spec(shape):
        # Constant block index -> weights stay resident in VMEM across steps.
        return pl.BlockSpec(shape, lambda i: (0, 0))

    flops = 2 * Bp * (IN_DIM * H1 + H1 * H2 + H2 * OUT_PAD)
    bytes_accessed = (
        2 * (IN_DIM * H1 + H1 * H2 + H2 * OUT_PAD)      # bf16 weights (once)
        + 4 * (H1 + H2 + OUT_PAD)                        # f32 biases (once)
        + 4 * Bp * IN_DIM                                # activation stream in
        + 4 * Bp * OUT_PAD)                              # output stream

    out = pl.pallas_call(
        _mlp_head_kernel,
        out_shape=jax.ShapeDtypeStruct((Bp, OUT_PAD), jnp.float32),
        grid=grid,
        in_specs=[
            batch_spec(L_DIM), batch_spec(C_DIM), batch_spec(P_DIM),
            const_spec((L_DIM, H1)), const_spec((C_DIM, H1)),
            const_spec((P_DIM, H1)), const_spec((1, H1)),
            const_spec((H1, H2)), const_spec((1, H2)),
            const_spec((H2, OUT_PAD)), const_spec((1, OUT_PAD)),
        ],
        out_specs=pl.BlockSpec((TB, OUT_PAD), lambda i: (i, 0)),
        compiler_params=pltpu.CompilerParams(
            dimension_semantics=("parallel",)),
        cost_estimate=pl.CostEstimate(
            flops=flops, transcendentals=0, bytes_accessed=bytes_accessed),
    )(l_emb, c_emb, p_emb,
      prepared["w1l"], prepared["w1c"], prepared["w1p"], prepared["b1"],
      prepared["w2"], prepared["b2"], prepared["w3"], prepared["b3"])

    return out[:B, 0]


def lba_predictor_forward(l_emb, complex_emb, prot_emb, prepared_params):
    """Forward pass of LBAPredictor given the sub-module embeddings.

    l_emb: (B, 16), complex_emb: (B, 32), prot_emb: (B, 384)
    returns: squeeze of the (B, 1) head output (matches torch.squeeze(y_hat)).
    """
    y_hat = mlp_head(l_emb, complex_emb, prot_emb, prepared_params)  # (B,)
    return jnp.squeeze(y_hat)


def _reference(l_emb, complex_emb, prot_emb, params):
    emb = jnp.concatenate([l_emb, complex_emb, prot_emb], axis=1)
    h1 = jnp.maximum(emb @ params["w1"] + params["b1"], 0.0)
    h2 = jnp.maximum(h1 @ params["w2"] + params["b2"], 0.0)
    y = jnp.maximum(h2 @ params["w3"] + params["b3"], 0.0)
    return jnp.squeeze(y)


if __name__ == "__main__":
    key = jax.random.PRNGKey(0)
    kp, kl, kc, kr = jax.random.split(key, 4)

    B = 2
    params = init_params(kp)
    prepared = prepare_head_params(params)

    # Deterministic stand-ins for the GNN / multimodal-network embeddings.
    l_emb = jax.random.normal(kl, (B, L_DIM), jnp.float32)
    complex_emb = jax.random.normal(kc, (B, C_DIM), jnp.float32)
    prot_emb = jax.random.normal(kr, (B, P_DIM), jnp.float32)

    y = lba_predictor_forward(l_emb, complex_emb, prot_emb, prepared)
    y = jax.block_until_ready(y)
    y_ref = _reference(l_emb, complex_emb, prot_emb, params)
    assert y.shape == (B,), y.shape
    assert jnp.allclose(y, y_ref, atol=3e-2, rtol=3e-2), (y, y_ref)

    # Multi-tile / padded-batch path (exercises grid pipelining + padding).
    B2 = 300
    k1, k2, k3 = jax.random.split(jax.random.PRNGKey(1), 3)
    l2 = jax.random.normal(k1, (B2, L_DIM), jnp.float32)
    c2 = jax.random.normal(k2, (B2, C_DIM), jnp.float32)
    p2 = jax.random.normal(k3, (B2, P_DIM), jnp.float32)
    y2 = jax.block_until_ready(mlp_head(l2, c2, p2, prepared, block_b=128))
    y2_ref = _reference(l2, c2, p2, params)
    assert y2.shape == (B2,), y2.shape
    assert jnp.allclose(y2, y2_ref, atol=3e-2, rtol=3e-2)

    print("KERNEL_OK")
</pallas_src>

<mosaic_0001>
module attributes {stable_mosaic.version = 11 : i64} {
  func.func @_mlp_head_kernel(%arg0: i32, %arg1: memref<8x16xf32, #tpu.memory_space<vmem>>, %arg2: memref<8x32xf32, #tpu.memory_space<vmem>>, %arg3: memref<8x384xf32, #tpu.memory_space<vmem>>, %arg4: memref<16x256xbf16, #tpu.memory_space<vmem>>, %arg5: memref<32x256xbf16, #tpu.memory_space<vmem>>, %arg6: memref<384x256xbf16, #tpu.memory_space<vmem>>, %arg7: memref<1x256xf32, #tpu.memory_space<vmem>>, %arg8: memref<256x128xbf16, #tpu.memory_space<vmem>>, %arg9: memref<1x128xf32, #tpu.memory_space<vmem>>, %arg10: memref<128x128xbf16, #tpu.memory_space<vmem>>, %arg11: memref<1x128xf32, #tpu.memory_space<vmem>>, %arg12: memref<8x128xf32, #tpu.memory_space<vmem>>) attributes {dimension_semantics = [#tpu.dimension_semantics<parallel>], iteration_bounds = array<i64: 1>, scalar_prefetch = 0 : i64, scratch_operands = 0 : i64, tpu.core_type = #tpu.core_type<tc>, window_params = [{transform_indices = @transform_0, window_bounds = array<i64: 8, 16>}, {transform_indices = @transform_1, window_bounds = array<i64: 8, 32>}, {transform_indices = @transform_2, window_bounds = array<i64: 8, 384>}, {pipeline_mode = #tpu.pipeline_mode<synchronous>, transform_indices = @transform_3, window_bounds = array<i64: 16, 256>}, {pipeline_mode = #tpu.pipeline_mode<synchronous>, transform_indices = @transform_4, window_bounds = array<i64: 32, 256>}, {pipeline_mode = #tpu.pipeline_mode<synchronous>, transform_indices = @transform_5, window_bounds = array<i64: 384, 256>}, {pipeline_mode = #tpu.pipeline_mode<synchronous>, transform_indices = @transform_6, window_bounds = array<i64: 1, 256>}, {pipeline_mode = #tpu.pipeline_mode<synchronous>, transform_indices = @transform_7, window_bounds = array<i64: 256, 128>}, {pipeline_mode = #tpu.pipeline_mode<synchronous>, transform_indices = @transform_8, window_bounds = array<i64: 1, 128>}, {pipeline_mode = #tpu.pipeline_mode<synchronous>, transform_indices = @transform_9, window_bounds = array<i64: 128, 128>}, {pipeline_mode = #tpu.pipeline_mode<synchronous>, transform_indices = @transform_10, window_bounds = array<i64: 1, 128>}, {transform_indices = @transform_11, window_bounds = array<i64: 8, 128>}]} {
    %c0 = arith.constant 0 : index
    %c0_0 = arith.constant 0 : index
    %0 = vector.load %arg1[%c0, %c0_0] : memref<8x16xf32, #tpu.memory_space<vmem>>, vector<8x16xf32>
    %1 = arith.truncf %0 : vector<8x16xf32> to vector<8x16xbf16>
    %c0_1 = arith.constant 0 : index
    %c0_2 = arith.constant 0 : index
    %2 = vector.load %arg2[%c0_1, %c0_2] : memref<8x32xf32, #tpu.memory_space<vmem>>, vector<8x32xf32>
    %3 = arith.truncf %2 : vector<8x32xf32> to vector<8x32xbf16>
    %c0_3 = arith.constant 0 : index
    %c0_4 = arith.constant 0 : index
    %4 = vector.load %arg3[%c0_3, %c0_4] : memref<8x384xf32, #tpu.memory_space<vmem>>, vector<8x384xf32>
    %5 = arith.truncf %4 : vector<8x384xf32> to vector<8x384xbf16>
    %c0_5 = arith.constant 0 : index
    %c0_6 = arith.constant 0 : index
    %6 = vector.load %arg6[%c0_5, %c0_6] : memref<384x256xbf16, #tpu.memory_space<vmem>>, vector<384x256xbf16>
    %cst = arith.constant dense<0.000000e+00> : vector<8x256xf32>
    %7 = tpu.matmul %5, %6, %cst {dimension_numbers = #tpu.dot_dimension_numbers<[1], [0], [0], [1], [0, 0, 1, 1], [], []>} : vector<8x384xbf16>, vector<384x256xbf16>, vector<8x256xf32> -> vector<8x256xf32>
    %c0_7 = arith.constant 0 : index
    %c0_8 = arith.constant 0 : index
    %8 = vector.load %arg5[%c0_7, %c0_8] : memref<32x256xbf16, #tpu.memory_space<vmem>>, vector<32x256xbf16>
    %cst_9 = arith.constant dense<0.000000e+00> : vector<8x256xf32>
    %9 = tpu.matmul %3, %8, %cst_9 {dimension_numbers = #tpu.dot_dimension_numbers<[1], [0], [0], [1], [0, 0, 1, 1], [], []>} : vector<8x32xbf16>, vector<32x256xbf16>, vector<8x256xf32> -> vector<8x256xf32>
    %10 = arith.addf %7, %9 : vector<8x256xf32>
    %c0_10 = arith.constant 0 : index
    %c0_11 = arith.constant 0 : index
    %11 = vector.load %arg4[%c0_10, %c0_11] : memref<16x256xbf16, #tpu.memory_space<vmem>>, vector<16x256xbf16>
    %cst_12 = arith.constant dense<0.000000e+00> : vector<8x256xf32>
    %12 = tpu.matmul %1, %11, %cst_12 {dimension_numbers = #tpu.dot_dimension_numbers<[1], [0], [0], [1], [0, 0, 1, 1], [], []>} : vector<8x16xbf16>, vector<16x256xbf16>, vector<8x256xf32> -> vector<8x256xf32>
    %13 = arith.addf %10, %12 : vector<8x256xf32>
    %c0_13 = arith.constant 0 : index
    %c0_14 = arith.constant 0 : index
    %14 = vector.load %arg7[%c0_13, %c0_14] : memref<1x256xf32, #tpu.memory_space<vmem>>, vector<1x256xf32>
    %15 = vector.broadcast %14 : vector<1x256xf32> to vector<8x256xf32>
    %16 = arith.addf %13, %15 : vector<8x256xf32>
    %cst_15 = arith.constant 0.000000e+00 : f32
    %17 = vector.broadcast %cst_15 : f32 to vector<8x256xf32>
    %18 = arith.maximumf %16, %17 : vector<8x256xf32>
    %19 = arith.truncf %18 : vector<8x256xf32> to vector<8x256xbf16>
    %c0_16 = arith.constant 0 : index
    %c0_17 = arith.constant 0 : index
    %20 = vector.load %arg8[%c0_16, %c0_17] : memref<256x128xbf16, #tpu.memory_space<vmem>>, vector<256x128xbf16>
    %cst_18 = arith.constant dense<0.000000e+00> : vector<8x128xf32>
    %21 = tpu.matmul %19, %20, %cst_18 {dimension_numbers = #tpu.dot_dimension_numbers<[1], [0], [0], [1], [0, 0, 1, 1], [], []>} : vector<8x256xbf16>, vector<256x128xbf16>, vector<8x128xf32> -> vector<8x128xf32>
    %c0_19 = arith.constant 0 : index
    %c0_20 = arith.constant 0 : index
    %22 = vector.load %arg9[%c0_19, %c0_20] : memref<1x128xf32, #tpu.memory_space<vmem>>, vector<1x128xf32>
    %23 = vector.broadcast %22 : vector<1x128xf32> to vector<8x128xf32>
    %24 = arith.addf %21, %23 : vector<8x128xf32>
    %cst_21 = arith.constant 0.000000e+00 : f32
    %25 = vector.broadcast %cst_21 : f32 to vector<8x128xf32>
    %26 = arith.maximumf %24, %25 : vector<8x128xf32>
    %27 = arith.truncf %26 : vector<8x128xf32> to vector<8x128xbf16>
    %c0_22 = arith.constant 0 : index
    %c0_23 = arith.constant 0 : index
    %28 = vector.load %arg10[%c0_22, %c0_23] : memref<128x128xbf16, #tpu.memory_space<vmem>>, vector<128x128xbf16>
    %cst_24 = arith.constant dense<0.000000e+00> : vector<8x128xf32>
    %29 = tpu.matmul %27, %28, %cst_24 {dimension_numbers = #tpu.dot_dimension_numbers<[1], [0], [0], [1], [0, 0, 1, 1], [], []>} : vector<8x128xbf16>, vector<128x128xbf16>, vector<8x128xf32> -> vector<8x128xf32>
    %c0_25 = arith.constant 0 : index
    %c0_26 = arith.constant 0 : index
    %30 = vector.load %arg11[%c0_25, %c0_26] : memref<1x128xf32, #tpu.memory_space<vmem>>, vector<1x128xf32>
    %31 = vector.broadcast %30 : vector<1x128xf32> to vector<8x128xf32>
    %32 = arith.addf %29, %31 : vector<8x128xf32>
    %cst_27 = arith.constant 0.000000e+00 : f32
    %33 = vector.broadcast %cst_27 : f32 to vector<8x128xf32>
    %34 = arith.maximumf %32, %33 : vector<8x128xf32>
    %c0_28 = arith.constant 0 : index
    %c0_29 = arith.constant 0 : index
    %35 = vector.load %arg12[%c0_28, %c0_29] : memref<8x128xf32, #tpu.memory_space<vmem>>, vector<8x128xf32>
    tpu.vector_store %arg12[%c0_28, %c0_29], %34 {strides = array<i32>} : memref<8x128xf32, #tpu.memory_space<vmem>>, vector<8x128xf32>,
    return
  }
  func.func @transform_0(%arg0: i32) -> (i32, i32) {
    %c0_i32 = arith.constant 0 : i32
    %c0_i32_0 = arith.constant 0 : i32
    return %arg0, %c0_i32 : i32, i32
  }
  func.func @transform_1(%arg0: i32) -> (i32, i32) {
    %c0_i32 = arith.constant 0 : i32
    %c0_i32_0 = arith.constant 0 : i32
    return %arg0, %c0_i32 : i32, i32
  }
  func.func @transform_2(%arg0: i32) -> (i32, i32) {
    %c0_i32 = arith.constant 0 : i32
    %c0_i32_0 = arith.constant 0 : i32
    return %arg0, %c0_i32 : i32, i32
  }
  func.func @transform_3(%arg0: i32) -> (i32, i32) {
    %c0_i32 = arith.constant 0 : i32
    %c0_i32_0 = arith.constant 0 : i32
    %c0_i32_1 = arith.constant 0 : i32
    return %c0_i32, %c0_i32_0 : i32, i32
  }
  func.func @transform_4(%arg0: i32) -> (i32, i32) {
    %c0_i32 = arith.constant 0 : i32
    %c0_i32_0 = arith.constant 0 : i32
    %c0_i32_1 = arith.constant 0 : i32
    return %c0_i32, %c0_i32_0 : i32, i32
  }
  func.func @transform_5(%arg0: i32) -> (i32, i32) {
    %c0_i32 = arith.constant 0 : i32
    %c0_i32_0 = arith.constant 0 : i32
    %c0_i32_1 = arith.constant 0 : i32
    return %c0_i32, %c0_i32_0 : i32, i32
  }
  func.func @transform_6(%arg0: i32) -> (i32, i32) {
    %c0_i32 = arith.constant 0 : i32
    %c0_i32_0 = arith.constant 0 : i32
    %c0_i32_1 = arith.constant 0 : i32
    return %c0_i32, %c0_i32_0 : i32, i32
  }
  func.func @transform_7(%arg0: i32) -> (i32, i32) {
    %c0_i32 = arith.constant 0 : i32
    %c0_i32_0 = arith.constant 0 : i32
    %c0_i32_1 = arith.constant 0 : i32
    return %c0_i32, %c0_i32_0 : i32, i32
  }
  func.func @transform_8(%arg0: i32) -> (i32, i32) {
    %c0_i32 = arith.constant 0 : i32
    %c0_i32_0 = arith.constant 0 : i32
    %c0_i32_1 = arith.constant 0 : i32
    return %c0_i32, %c0_i32_0 : i32, i32
  }
  func.func @transform_9(%arg0: i32) -> (i32, i32) {
    %c0_i32 = arith.constant 0 : i32
    %c0_i32_0 = arith.constant 0 : i32
    %c0_i32_1 = arith.constant 0 : i32
    return %c0_i32, %c0_i32_0 : i32, i32
  }
  func.func @transform_10(%arg0: i32) -> (i32, i32) {
    %c0_i32 = arith.constant 0 : i32
    %c0_i32_0 = arith.constant 0 : i32
    %c0_i32_1 = arith.constant 0 : i32
    return %c0_i32, %c0_i32_0 : i32, i32
  }
  func.func @transform_11(%arg0: i32) -> (i32, i32) {
    %c0_i32 = arith.constant 0 : i32
    %c0_i32_0 = arith.constant 0 : i32
    return %arg0, %c0_i32 : i32, i32
  }
}

</mosaic_0001>

<bundles_post_ra>
// kernel: tpu_custom_call.1
= control target key start
LH: loop header
LB: loop body
LE: loop exit
PB: predicated region body
PF: predicated region fallthrough
CT: control target
= control target key end

     0   :  { %16 = vsyncpa [#allocation3], 0  ;;  %s1661_s0 = inlined_call_operand.hbm [shape: f32[8,16], index: 0, kind: input, shape index: {}]   ;;  %s1662_s1 = inlined_call_operand.hbm [shape: f32[8,32], index: 1, kind: input, shape index: {}]   ;;  %s1663_s2 = inlined_call_operand.hbm [shape: f32[8,384], index: 2, kind: input, shape index: {}]   ;;  %s1664_s3 = inlined_call_operand.hbm [shape: bf16[16,256], index: 3, kind: input, shape index: {}]   ;;  %s1665_s4 = inlined_call_operand.hbm [shape: bf16[32,256], index: 4, kind: input, shape index: {}]   ;;  %s1666_s5 = inlined_call_operand.hbm [shape: bf16[384,256], index: 5, kind: input, shape index: {}]   ;;  %s1667_s6 = inlined_call_operand.vmem [shape: f32[1,256], index: 6, kind: input, shape index: {}]   ;;  %s1668_s7 = inlined_call_operand.hbm [shape: bf16[256,128], index: 7, kind: input, shape index: {}]   ;;  %s1669_s8 = inlined_call_operand.vmem [shape: f32[1,128], index: 8, kind: input, shape index: {}]   ;;  %s1670_s9 = inlined_call_operand.hbm [shape: bf16[128,128], index: 9, kind: input, shape index: {}]   ;;  %s1671_s10 = inlined_call_operand.vmem [shape: f32[1,128], index: 10, kind: input, shape index: {}]   ;;  %s1672_s11 = inlined_call_operand.hbm [shape: f32[8,128], index: 11, kind: output, shape index: {}]  }
   0x1   :  { %17 = vsyncpa [#allocation6], 0 }
   0x2   :  { %18 = vsyncpa [#allocation9], 0 }
   0x3   :  { %19 = vsyncpa [#allocation12], 0 }
   0x4   :  { %20 = vsyncpa [#allocation15], 0 }
   0x5   :  { %21 = vsyncpa [#allocation4], 0  ;;  %s1442_s17 = smov [#allocation5]   ;;  %s1443_s19 = smov [#allocation8]  }
   0x6   :  { %s38_s18 = sshll.u32 %s1442_s17, 4  ;;  %s57_s20 = sshll.u32 %s1443_s19, 4  ;;  %s39_s18 = int_to_ptr.vmem [resolvable:$true] %s38_s18  ;;  %s1518_s20 = int_to_ptr.vmem [resolvable:$true] %s57_s20 }
   0x7   :  { %s1232_s23 = scalar_lea.hbm %s1662_s1, 128 }
   0x8   :  { %p1233_p0 = scmp.ne.s32.totalorder %s1662_s1, %s1232_s23  ;;  %p1236_p1 = scmp.lt.u32.totalorder %s1232_s23, %s1662_s1 }
   0xa   :  { %p1238_p2 = pnand %p1236_p1, %p1233_p0 }
   0xc   :  { %1241 = shalt.err (!%p1238_p2)
}
   0xd   :  { %s1242_s28 = scalar_lea.vmem %s39_s18, 128  ;;  %p1247_p4 = scmp.lt.s32.totalorder %s39_s18, %s39_s18 }
   0xe   :  { %p1243_p3 = scmp.ne.s32.totalorder %s39_s18, %s1242_s28  ;;  %p1248_p5 = scmp.lt.s32.totalorder %s1242_s28, %s1242_s28 }
  0x10   :  { %p1249_p6 = por %p1248_p5, %p1247_p4 }
  0x12   :  { %p1250_p7 = pnand %p1249_p6, %p1243_p3 }
  0x14   :  { %1253 = shalt.err (!%p1250_p7)
}
  0x15   :  { %41 = dma.hbm_to_vmem [thread:$0]  %s1662_s1, 128, %s39_s18, [#allocation6]  }
  0x16   :  { %s1254_s14 = scalar_lea.hbm %s1664_s3, 256 }
  0x17   :  { %p1255_p8 = scmp.ne.s32.totalorder %s1664_s3, %s1254_s14  ;;  %p1258_p9 = scmp.lt.u32.totalorder %s1254_s14, %s1664_s3 }
  0x19   :  { %p1260_p10 = pnand %p1258_p9, %p1255_p8 }
  0x1b   :  { %1263 = shalt.err (!%p1260_p10)
}
  0x1c   :  { %s1264_s21 = scalar_lea.vmem %s1518_s20, 256  ;;  %p1269_p12 = scmp.lt.s32.totalorder %s1518_s20, %s1518_s20 }
  0x1d   :  { %p1265_p11 = scmp.ne.s32.totalorder %s1518_s20, %s1264_s21  ;;  %p1270_p13 = scmp.lt.s32.totalorder %s1264_s21, %s1264_s21 }
  0x1f   :  { %p1271_p0 = por %p1270_p13, %p1269_p12 }
  0x21   :  { %p1272_p1 = pnand %p1271_p0, %p1265_p11 }
  0x23   :  { %1275 = shalt.err (!%p1272_p1)
}
  0x24   :  { %s1444_s1 = smov 128   ;;  %s1445_s18 = smov 8  }
  0x25   :  { %63 = dma.hbm_to_vmem [thread:$0]  %s1664_s3, 256, %s1518_s20, [#allocation9], %s1444_s1, %s1444_s1, %s1445_s18  }
  0x26   :  { %s1446_s24 = smov [#allocation11]   ;;  %s1447_s26 = smov [#allocation2]  }
  0x27   :  { %s81_s25 = sshll.u32 %s1446_s24, 4  ;;  %s28_s27 = sshll.u32 %s1447_s26, 4  ;;  %s82_s25 = int_to_ptr.vmem [resolvable:$true] %s81_s25  ;;  %s29_s27 = int_to_ptr.vmem [resolvable:$true] %s28_s27 }
  0x28   :  { %s1276_s30 = scalar_lea.hbm %s1666_s5, 6144 }
  0x29   :  { %p1277_p2 = scmp.ne.s32.totalorder %s1666_s5, %s1276_s30  ;;  %p1280_p3 = scmp.lt.u32.totalorder %s1276_s30, %s1666_s5 }
  0x2b   :  { %p1282_p4 = pnand %p1280_p3, %p1277_p2 }
  0x2d   :  { %1285 = shalt.err (!%p1282_p4)
}
  0x2e   :  { %s1286_s3 = scalar_lea.vmem %s82_s25, 6144  ;;  %p1291_p6 = scmp.lt.s32.totalorder %s82_s25, %s82_s25 }
  0x2f   :  { %p1287_p5 = scmp.ne.s32.totalorder %s82_s25, %s1286_s3  ;;  %p1292_p7 = scmp.lt.s32.totalorder %s1286_s3, %s1286_s3 }
  0x31   :  { %p1293_p8 = por %p1292_p7, %p1291_p6 }
  0x33   :  { %p1294_p9 = pnand %p1293_p8, %p1287_p5 }
  0x35   :  { %1297 = shalt.err (!%p1294_p9)
}
  0x36   :  { %87 = dma.hbm_to_vmem [thread:$0]  %s1666_s5, 6144, %s82_s25, [#allocation12], %s1444_s1, %s1444_s1, %s1445_s18  }
  0x37   :  { %s1298_s21 = scalar_lea.hbm %s1661_s0, 128 }
  0x38   :  { %p1299_p10 = scmp.ne.s32.totalorder %s1661_s0, %s1298_s21  ;;  %p1302_p11 = scmp.lt.u32.totalorder %s1298_s21, %s1661_s0 }
  0x3a   :  { %p1304_p12 = pnand %p1302_p11, %p1299_p10 }
  0x3c   :  { %1307 = shalt.err (!%p1304_p12)
}
  0x3d   :  { %s1308_s28 = scalar_lea.vmem %s29_s27, 128  ;;  %p1313_p0 = scmp.lt.s32.totalorder %s29_s27, %s29_s27 }
  0x3e   :  { %p1309_p13 = scmp.ne.s32.totalorder %s29_s27, %s1308_s28  ;;  %p1314_p1 = scmp.lt.s32.totalorder %s1308_s28, %s1308_s28 }
  0x40   :  { %p1315_p2 = por %p1314_p1, %p1313_p0 }
  0x42   :  { %p1316_p3 = pnand %p1315_p2, %p1309_p13 }
  0x44   :  { %1319 = shalt.err (!%p1316_p3)
}
  0x45   :  { %31 = dma.hbm_to_vmem [thread:$0]  %s1661_s0, 128, %s29_s27, [#allocation3]  }
  0x46   :  { %s1448_s29 = smov [#allocation7]   ;;  %s1449_s12 = smov [#allocation10]  }
  0x47   :  { %s48_s30 = sshll.u32 %s1448_s29, 4  ;;  %s69_s13 = sshll.u32 %s1449_s12, 4  ;;  %s49_s30 = int_to_ptr.vmem [resolvable:$true] %s48_s30  ;;  %s1579_s13 = int_to_ptr.vmem [resolvable:$true] %s69_s13 }
  0x48   :  { %s1320_s3 = scalar_lea.hbm %s1663_s2, 384 }
  0x49   :  { %p1321_p4 = scmp.ne.s32.totalorder %s1663_s2, %s1320_s3  ;;  %p1324_p5 = scmp.lt.u32.totalorder %s1320_s3, %s1663_s2 }
  0x4b   :  { %p1326_p6 = pnand %p1324_p5, %p1321_p4 }
  0x4d   :  { %1329 = shalt.err (!%p1326_p6)
}
  0x4e   :  { %s1330_s0 = scalar_lea.vmem %s49_s30, 384  ;;  %p1335_p8 = scmp.lt.s32.totalorder %s49_s30, %s49_s30 }
  0x4f   :  { %p1331_p7 = scmp.ne.s32.totalorder %s49_s30, %s1330_s0  ;;  %p1336_p9 = scmp.lt.s32.totalorder %s1330_s0, %s1330_s0 }
  0x51   :  { %p1337_p10 = por %p1336_p9, %p1335_p8 }
  0x53   :  { %p1338_p11 = pnand %p1337_p10, %p1331_p7 }
  0x55   :  { %1341 = shalt.err (!%p1338_p11)
}
  0x56   :  { %51 = dma.hbm_to_vmem [thread:$0]  %s1663_s2, 384, %s49_s30, [#allocation6]  }
  0x57   :  { %s1342_s24 = scalar_lea.hbm %s1665_s4, 512 }
  0x58   :  { %p1343_p12 = scmp.ne.s32.totalorder %s1665_s4, %s1342_s24  ;;  %p1346_p13 = scmp.lt.u32.totalorder %s1342_s24, %s1665_s4 }
  0x5a   :  { %p1348_p0 = pnand %p1346_p13, %p1343_p12 }
  0x5c   :  { %1351 = shalt.err (!%p1348_p0)
}
  0x5d   :  { %s1352_s29 = scalar_lea.vmem %s1579_s13, 512  ;;  %p1357_p2 = scmp.lt.s32.totalorder %s1579_s13, %s1579_s13 }
  0x5e   :  { %p1353_p1 = scmp.ne.s32.totalorder %s1579_s13, %s1352_s29  ;;  %p1358_p3 = scmp.lt.s32.totalorder %s1352_s29, %s1352_s29 }
  0x60   :  { %p1359_p4 = por %p1358_p3, %p1357_p2 }
  0x62   :  { %p1360_p5 = pnand %p1359_p4, %p1353_p1 }
  0x64   :  { %1363 = shalt.err (!%p1360_p5)
}
  0x65   :  { %75 = dma.hbm_to_vmem [thread:$0]  %s1665_s4, 512, %s1579_s13, [#allocation9], %s1444_s1, %s1444_s1, %s1445_s18  }
  0x66   :  { %s1450_s12 = smov [#allocation13]   ;;  %s1364_s20 = scalar_lea.hbm %s1668_s7, 2048 }
  0x67   :  { %s95_s14 = sshll.u32 %s1450_s12, 4  ;;  %p1365_p6 = scmp.ne.s32.totalorder %s1668_s7, %s1364_s20  ;;  %s96_s14 = int_to_ptr.vmem [resolvable:$true] %s95_s14 }
  0x68   :  { %p1368_p7 = scmp.lt.u32.totalorder %s1364_s20, %s1668_s7 }
  0x6a   :  { %p1370_p8 = pnand %p1368_p7, %p1365_p6 }
  0x6c   :  { %1373 = shalt.err (!%p1370_p8)
}
  0x6d   :  { %s1374_s27 = scalar_lea.vmem %s96_s14, 2048  ;;  %p1379_p10 = scmp.lt.s32.totalorder %s96_s14, %s96_s14 }
  0x6e   :  { %p1375_p9 = scmp.ne.s32.totalorder %s96_s14, %s1374_s27  ;;  %p1380_p11 = scmp.lt.s32.totalorder %s1374_s27, %s1374_s27 }
  0x70   :  { %p1381_p12 = por %p1380_p11, %p1379_p10 }
  0x72   :  { %p1382_p13 = pnand %p1381_p12, %p1375_p9 }
  0x74   :  { %1385 = shalt.err (!%p1382_p13)
}
  0x75   :  { %s1451_s4 = smov 64   ;;  %s1452_s1 = smov 4  }
  0x76   :  { %101 = dma.hbm_to_vmem [thread:$0]  %s1668_s7, 2048, %s96_s14, [#allocation12], %s1451_s4, %s1451_s4, %s1452_s1  }
  0x77   :  { %s1453_s21 = smov [#allocation14]   ;;  %s1386_s26 = scalar_lea.hbm %s1670_s9, 1024 }
  0x78   :  { %s109_s22 = sshll.u32 %s1453_s21, 4  ;;  %p1387_p0 = scmp.ne.s32.totalorder %s1670_s9, %s1386_s26  ;;  %s110_s22 = int_to_ptr.vmem [resolvable:$true] %s109_s22 }
  0x79   :  { %p1390_p1 = scmp.lt.u32.totalorder %s1386_s26, %s1670_s9 }
  0x7b   :  { %p1392_p2 = pnand %p1390_p1, %p1387_p0 }
  0x7d   :  { %1395 = shalt.err (!%p1392_p2)
}
  0x7e   :  { %s1396_s2 = scalar_lea.vmem %s110_s22, 1024  ;;  %p1401_p4 = scmp.lt.s32.totalorder %s110_s22, %s110_s22 }
  0x7f   :  { %p1397_p3 = scmp.ne.s32.totalorder %s110_s22, %s1396_s2  ;;  %p1402_p5 = scmp.lt.s32.totalorder %s1396_s2, %s1396_s2 }
  0x81   :  { %p1403_p6 = por %p1402_p5, %p1401_p4 }
  0x83   :  { %p1404_p7 = pnand %p1403_p6, %p1397_p3 }
  0x85   :  { %1407 = shalt.err (!%p1404_p7)
}
  0x86   :  { %115 = dma.hbm_to_vmem [thread:$0]  %s1670_s9, 1024, %s110_s22, [#allocation15], %s1451_s4, %s1451_s4, %s1452_s1  }
  0x87   :  { %1430 = dma.done.wait [#allocation3], 128  }
  0x88   :  { %1431 = vsyncadd [#allocation3], 4294967168 }
  0x89   :  { %1432 = dma.done.wait [#allocation6], 512  }
  0x8a   :  { %1433 = vsyncadd [#allocation6], 4294966784 }
  0x8b   :  { %1434 = dma.done.wait [#allocation9], 768  }
  0x8c   :  { %1435 = vsyncadd [#allocation9], 4294966528 }
  0x8d   :  { %1436 = dma.done.wait [#allocation12], 8192  }
  0x8e   :  { %1437 = vsyncadd [#allocation12], 4294959104 }
  0x8f   :  { %1438 = dma.done.wait [#allocation15], 1024  }
  0x90   :  { %1439 = vsyncadd [#allocation15], 4294966272  ;;  %v1454_v0 = vmov 0   ;;  %v1127_v1 = vld [vmem:[#allocation11 + $0x4] ss:$8 sps:$4 sm:$0xff]   ;;  %v145_v13 = vld [vmem:[#allocation5] sm:$0xff] }
  0x91   :  { %261 = vmatprep.mubr.bf16.mxu0 %v1454_v0  ;;  %v1129_v2 = vld [vmem:[#allocation11] ss:$8 sps:$4 sm:$0xff]   ;;  %510 = vmatprep.subr.bf16.mxu1 %v1127_v1  ;;  %v1130_v3 = vld [vmem:[#allocation11 + $0x14] ss:$8 sps:$4 sm:$0xff]   ;;  %v1132_v4 = vld [vmem:[#allocation11 + $0x10] ss:$8 sps:$4 sm:$0xff]   ;;  %v146_v15 = vpack.c.bf16 %v145_v13, %v145_v13 }
  0x92   :  { %511 = vmatpush1.bf16.msra.mxu1 %v1129_v2  ;;  %v1133_v5 = vld [vmem:[#allocation11 + $0x24] ss:$8 sps:$4 sm:$0xff]   ;;  %v1135_v6 = vld [vmem:[#allocation11 + $0x20] ss:$8 sps:$4 sm:$0xff]   ;;  %v1136_v9 = vld [vmem:[#allocation11 + $0x34] ss:$8 sps:$4 sm:$0xff]  }
  0x93   :  { %512 = vmatprep.subr.bf16.mxu1 %v1130_v3  ;;  %v1141_v7 = vld [vmem:[#allocation10 + $0x4] ss:$8 sps:$4 sm:$0xff]   ;;  %v1144_v8 = vld [vmem:[#allocation10] ss:$8 sps:$4 sm:$0xff]   ;;  %v1147_v10 = vld [vmem:[#allocation10 + $0x14] ss:$8 sps:$4 sm:$0xff]  }
  0x94   :  { %229 = vmatprep.subr.bf16.mxu0 %v1141_v7  ;;  %v1150_v11 = vld [vmem:[#allocation10 + $0x10] ss:$8 sps:$4 sm:$0xff]   ;;  %v1139_v14 = vld [vmem:[#allocation11 + $0x44] ss:$8 sps:$4 sm:$0xff]   ;;  %v1143_v17 = vld [vmem:[#allocation11 + $0x40] ss:$8 sps:$4 sm:$0xff]  }
  0x95   :  { %230 = vmatpush1.bf16.msra.mxu0 %v1144_v8  ;;  %v1138_v12 = vld [vmem:[#allocation11 + $0x30] ss:$8 sps:$4 sm:$0xff]   ;;  %v1156_v16 = vld [vmem:[#allocation11 + $0x104] ss:$8 sps:$4 sm:$0xff]   ;;  %vm225_vm0 = vcmask 261120   ;;  %vm604_vm1 = vcmask 130048  }
  0x96   :  { %513 = vmatpush1.bf16.msra.mxu1 %v1132_v4  ;;  %231 = vmatprep.subr.bf16.mxu0 %v1147_v10  ;;  %v1154_v18 = vld [vmem:[#allocation11 + $0x100] ss:$8 sps:$4 sm:$0xff]   ;;  %v1145_v19 = vld [vmem:[#allocation11 + $0x54] ss:$8 sps:$4 sm:$0xff]   ;;  %v1149_v21 = vld [vmem:[#allocation11 + $0x50] ss:$8 sps:$4 sm:$0xff]  }
  0x97   :  { %514 = vmatprep.subr.bf16.mxu1 %v1133_v5  ;;  %v1162_v20 = vld [vmem:[#allocation11 + $0x114] ss:$8 sps:$4 sm:$0xff]   ;;  %v1160_v22 = vld [vmem:[#allocation11 + $0x110] ss:$8 sps:$4 sm:$0xff]   ;;  %v1168_v23 = vld [vmem:[#allocation11 + $0x124] ss:$8 sps:$4 sm:$0xff]  }
  0x98   :  { %v1151_v24 = vld [vmem:[#allocation11 + $0x64] ss:$8 sps:$4 sm:$0xff]   ;;  %v1153_v25 = vld [vmem:[#allocation11 + $0x60] ss:$8 sps:$4 sm:$0xff]   ;;  %v1174_v27 = vld [vmem:[#allocation11 + $0x134] ss:$8 sps:$4 sm:$0xff]  }
  0x99   :  { %232 = vmatpush1.bf16.msra.mxu0 %v1150_v11  ;;  %v1166_v26 = vld [vmem:[#allocation11 + $0x120] ss:$8 sps:$4 sm:$0xff]   ;;  %v1157_v28 = vld [vmem:[#allocation11 + $0x74] ss:$8 sps:$4 sm:$0xff]   ;;  %v1159_v29 = vld [vmem:[#allocation11 + $0x70] ss:$8 sps:$4 sm:$0xff]  }
  0x9a   :  { %515 = vmatpush1.bf16.msra.mxu1 %v1135_v6  ;;  %551 = vmatprep.subr.bf16.mxu0 %v1156_v16  ;;  %v1172_v30 = vld [vmem:[#allocation11 + $0x130] ss:$8 sps:$4 sm:$0xff]   ;;  %v1180_v31 = vld [vmem:[#allocation11 + $0x144] ss:$8 sps:$4 sm:$0xff]   ;;  %v1165_v33 = vld [vmem:[#allocation11 + $0x80] ss:$8 sps:$4 sm:$0xff]  }
  0x9b   :  { %516 = vmatprep.subr.bf16.mxu1 %v1136_v9  ;;  %v1163_v32 = vld [vmem:[#allocation11 + $0x84] ss:$8 sps:$4 sm:$0xff]   ;;  %v1178_v34 = vld [vmem:[#allocation11 + $0x140] ss:$8 sps:$4 sm:$0xff]   ;;  %v1186_v35 = vld [vmem:[#allocation11 + $0x154] ss:$8 sps:$4 sm:$0xff]  }
  0x9c   :  { %982 = vmatmul.mubr.msk.bf16.vlgmr.msra.gmra.mrb[0].mxu0 %vm225_vm0, %v146_v15  ;;  %v1169_v36 = vld [vmem:[#allocation11 + $0x94] ss:$8 sps:$4 sm:$0xff]   ;;  %v1171_v37 = vld [vmem:[#allocation11 + $0x90] ss:$8 sps:$4 sm:$0xff]   ;;  %v1192_v39 = vld [vmem:[#allocation11 + $0x164] ss:$8 sps:$4 sm:$0xff]  }
  0x9d   :  { %552 = vmatpush1.bf16.msra.mxu0 %v1154_v18  ;;  %583 = vmatprep.mubr.bf16.mxu0 %v1454_v0  ;;  %v1184_v38 = vld [vmem:[#allocation11 + $0x150] ss:$8 sps:$4 sm:$0xff]   ;;  %v1175_v40 = vld [vmem:[#allocation11 + $0xa4] ss:$8 sps:$4 sm:$0xff]   ;;  %v1177_v42 = vld [vmem:[#allocation11 + $0xa0] ss:$8 sps:$4 sm:$0xff]  }
  0x9e   :  { %517 = vmatpush1.bf16.msra.mxu1 %v1138_v12  ;;  %553 = vmatprep.subr.bf16.mxu0 %v1162_v20  ;;  %v148_v41 = vld [vmem:[#allocation7 + $0x8] sm:$0xff]  ;;  %v1198_v44 = vld [vmem:[#allocation11 + $0x174] ss:$8 sps:$4 sm:$0xff]   ;;  %v1196_v47 = vld [vmem:[#allocation11 + $0x170] ss:$8 sps:$4 sm:$0xff]   ;;  %v1455_v18 = vmov 0.0  }
  0x9f   :  { %518 = vmatprep.subr.bf16.mxu1 %v1139_v14  ;;  %v1190_v43 = vld [vmem:[#allocation11 + $0x160] ss:$8 sps:$4 sm:$0xff]   ;;  %v151_v45 = vpack.c.bf16 %v148_v41, %v148_v41  ;;  %v1181_v46 = vld [vmem:[#allocation11 + $0xb4] ss:$8 sps:$4 sm:$0xff]   ;;  %v1183_v49 = vld [vmem:[#allocation11 + $0xb0] ss:$8 sps:$4 sm:$0xff]  }
  0xa0   :  { %v149_v48 = vld [vmem:[#allocation7 + $0x10] sm:$0xff]  ;;  %v1204_v50 = vld [vmem:[#allocation8 + $0x4] ss:$8 sps:$4 sm:$0xff]   ;;  %v1202_v52 = vld [vmem:[#allocation8] ss:$8 sps:$4 sm:$0xff]   ;;  %vm1456_vm2 = vmmov 0  }
  0xa1   :  { %554 = vmatpush1.bf16.msra.mxu0 %v1160_v22  ;;  %542 = vmatprep.mubr.bf16.mxu1 %v151_v45  ;;  %v1187_v51 = vld [vmem:[#allocation11 + $0xc4] ss:$8 sps:$4 sm:$0xff]   ;;  %v1189_v53 = vld [vmem:[#allocation11 + $0xc0] ss:$8 sps:$4 sm:$0xff]   ;;  %v152_v54 = vpack.c.bf16 %v149_v48, %v149_v48  ;;  %v1193_v55 = vld [vmem:[#allocation11 + $0xd4] ss:$8 sps:$4 sm:$0xff]  }
  0xa2   :  { %519 = vmatpush1.bf16.msra.mxu1 %v1143_v17  ;;  %555 = vmatprep.subr.bf16.mxu0 %v1168_v23  ;;  %v143_v56 = vld [vmem:[#allocation2] sm:$0xff]  ;;  %v1195_v57 = vld [vmem:[#allocation11 + $0xd0] ss:$8 sps:$4 sm:$0xff]   ;;  %v1205_v61 = vld [vmem:[#allocation11 + $0xf4] ss:$8 sps:$4 sm:$0xff]   ;;  %s1457_s20 = smov [#allocation16]  }
  0xa3   :  { %520 = vmatprep.subr.bf16.mxu1 %v1145_v19  ;;  %v1199_v58 = vld [vmem:[#allocation11 + $0xe4] ss:$8 sps:$4 sm:$0xff]   ;;  %v144_v59 = vpack.c.bf16 %v143_v56, %v143_v56  ;;  %v1201_v60 = vld [vmem:[#allocation11 + $0xe0] ss:$8 sps:$4 sm:$0xff]   ;;  %v1207_v62 = vld [vmem:[#allocation11 + $0xf0] ss:$8 sps:$4 sm:$0xff]  }
  0xa4   :  { %v147_v63 = vld [vmem:[#allocation7] sm:$0xff]  ;;  %v1208_v2 = vld [vmem:[#allocation13 + $0x40] sm:$0xff]   ;;  %v1210_v4 = vld [vmem:[#allocation13 + $0x48] sm:$0xff]   ;;  %s965_s16 = sshll.u32 %s1457_s20, 4  ;;  %s966_s16 = int_to_ptr.vmem [resolvable:$true] %s965_s16 }
  0xa5   :  { %556 = vmatpush1.bf16.msra.mxu0 %v1166_v26  ;;  %v150_v1 = vpack.c.bf16 %v147_v63, %v147_v63  ;;  %v1209_v3 = vld [vmem:[#allocation13] sm:$0xff]   ;;  %v1212_v5 = vld [vmem:[#allocation13 + $0x50] sm:$0xff]   ;;  %v1214_v7 = vld [vmem:[#allocation13 + $0x58] sm:$0xff]   ;;  %p1413_p9 = scmp.lt.s32.totalorder %s966_s16, %s966_s16 }
  0xa6   :  { %521 = vmatpush1.bf16.msra.mxu1 %v1149_v21  ;;  %557 = vmatprep.subr.bf16.mxu0 %v1174_v27  ;;  %v1213_v6 = vld [vmem:[#allocation13 + $0x10] sm:$0xff]   ;;  %v1215_v8 = vld [vmem:[#allocation13 + $0x18] sm:$0xff]   ;;  %v1216_v9 = vld [vmem:[#allocation13 + $0x60] sm:$0xff]  }
  0xa7   :  { %522 = vmatprep.subr.bf16.mxu1 %v1151_v24  ;;  %v1217_v10 = vld [vmem:[#allocation13 + $0x20] sm:$0xff]   ;;  %v1218_v11 = vld [vmem:[#allocation13 + $0x68] sm:$0xff]   ;;  %v1220_v13 = vld [vmem:[#allocation13 + $0x70] sm:$0xff]  }
  0xa8   :  { %v1219_v12 = vld [vmem:[#allocation13 + $0x28] sm:$0xff]   ;;  %v1221_v14 = vld [vmem:[#allocation13 + $0x30] sm:$0xff]   ;;  %v1222_v15 = vld [vmem:[#allocation13 + $0x78] sm:$0xff]  }
  0xa9   :  { %558 = vmatpush1.bf16.msra.mxu0 %v1172_v30  ;;  %v1223_v16 = vld [vmem:[#allocation13 + $0x38] sm:$0xff]   ;;  %v1224_v17 = vld [vmem:[#allocation14] sm:$0xff]   ;;  %v1225_v19 = vld [vmem:[#allocation14 + $0x8] sm:$0xff]  }
  0xaa   :  { %523 = vmatpush1.bf16.msra.mxu1 %v1153_v25  ;;  %559 = vmatprep.subr.bf16.mxu0 %v1180_v31  ;;  %v1226_v20 = vld [vmem:[#allocation14 + $0x10] sm:$0xff]   ;;  %v1227_v21 = vld [vmem:[#allocation14 + $0x18] sm:$0xff]   ;;  %v1228_v22 = vld [vmem:[#allocation14 + $0x20] sm:$0xff]  }
  0xab   :  { %524 = vmatprep.subr.bf16.mxu1 %v1157_v28  ;;  %v1229_v23 = vld [vmem:[#allocation14 + $0x28] sm:$0xff]  }
  0xad   :  { %560 = vmatpush1.bf16.msra.mxu0 %v1178_v34 }
  0xae   :  { %525 = vmatpush1.bf16.msra.mxu1 %v1159_v29  ;;  %561 = vmatprep.subr.bf16.mxu0 %v1186_v35 }
  0xaf   :  { %526 = vmatprep.subr.bf16.mxu1 %v1163_v32 }
  0xb1   :  { %562 = vmatpush1.bf16.msra.mxu0 %v1184_v38 }
  0xb2   :  { %527 = vmatpush1.bf16.msra.mxu1 %v1165_v33  ;;  %563 = vmatprep.subr.bf16.mxu0 %v1192_v39  ;;  %v653_v33 = vlaneseq }
  0xb3   :  { %528 = vmatprep.subr.bf16.mxu1 %v1169_v36 }
  0xb5   :  { %564 = vmatpush1.bf16.msra.mxu0 %v1190_v43 }
  0xb6   :  { %529 = vmatpush1.bf16.msra.mxu1 %v1171_v37  ;;  %565 = vmatprep.subr.bf16.mxu0 %v1198_v44  ;;  %v654_v37 = vshrl.u32 %v653_v33, 7 }
  0xb7   :  { %530 = vmatprep.subr.bf16.mxu1 %v1175_v40  ;;  %v651_v40 = vld [vmem:[%s1667_s6] sm:$0x3] }
  0xb8   :  { %v655_v38 = vsub.s32 0, %v654_v37  ;;  %v659_v41 = vsub.s32 1, %v654_v37 }
  0xb9   :  { %566 = vmatpush1.bf16.msra.mxu0 %v1196_v47 }
  0xba   :  { %531 = vmatpush1.bf16.msra.mxu1 %v1177_v42  ;;  %608 = vmatprep.subr.bf16.mxu0 %v1204_v50  ;;  %v656_v47 = vrot.slane %v651_v40, %v655_v38  ;;  %v660_v50 = vrot.slane %v651_v40, %v659_v41 }
  0xbb   :  { %532 = vmatprep.subr.bf16.mxu1 %v1181_v46 }
  0xbc   :  { %584 = vmatmul.mubr.bf16.vlgmr.msra.gmra.mrb[4].mxu0 %v152_v54 }
  0xbd   :  { %609 = vmatpush1.bf16.msra.mxu0 %v1202_v52  ;;  %640 = vmatprep.mubr.bf16.mxu0 %v1454_v0  ;;  %v1211_v0 = vld [vmem:[#allocation13 + $0x8] sm:$0xff]  }
  0xbe   :  { %533 = vmatpush1.bf16.msra.mxu1 %v1183_v49  ;;  %1060 = vmatprep.subr.bf16.mxu0 %v1208_v2 }
  0xbf   :  { %534 = vmatprep.subr.bf16.mxu1 %v1187_v51 }
  0xc2   :  { %535 = vmatpush1.bf16.msra.mxu1 %v1189_v53 }
  0xc3   :  { %536 = vmatprep.subr.bf16.mxu1 %v1193_v55 }
  0xc4   :  { %1033 = vmatmul.mubr.msk.bf16.vlgmr.msra.gmra.mrb[8].mxu0 %vm604_vm1, %v144_v59  ;;  %v1230_v59 = vld [vmem:[#allocation14 + $0x30] sm:$0xff]  }
  0xc5   :  { %1061 = vmatpush3.bf16.msra.mxu0 %v1209_v3 }
  0xc6   :  { %537 = vmatpush1.bf16.msra.mxu1 %v1195_v57  ;;  %1062 = vmatprep.subr.bf16.mxu0 %v1210_v4 }
  0xc7   :  { %538 = vmatprep.subr.bf16.mxu1 %v1199_v58 }
  0xc9   :  { %1063 = vmatpush3.bf16.msra.mxu0 %v1211_v0 }
  0xca   :  { %539 = vmatpush1.bf16.msra.mxu1 %v1201_v60  ;;  %1064 = vmatprep.subr.bf16.mxu0 %v1212_v5  ;;  %v1231_v60 = vld [vmem:[#allocation14 + $0x38] sm:$0xff]  }
  0xcb   :  { %540 = vmatprep.subr.bf16.mxu1 %v1205_v61 }
  0xcd   :  { %1065 = vmatpush3.bf16.msra.mxu0 %v1213_v6  ;;  %v1051_v6 = vld [vmem:[%s1671_s10] ss:$0 sm:$0xff] }
  0xce   :  { %541 = vmatpush1.bf16.msra.mxu1 %v1207_v62  ;;  %1066 = vmatprep.subr.bf16.mxu0 %v1214_v7  ;;  %v1034_v62 = vld [vmem:[%s1669_s8] ss:$0 sm:$0xff]  ;;  %s1408_s8 = scalar_lea.vmem %s966_s16, 128 }
  0xcf   :  { %1091 = vmatprep.subr.bf16.mxu1 %v1455_v18  ;;  %p1409_p8 = scmp.ne.s32.totalorder %s966_s16, %s1408_s8  ;;  %p1414_p10 = scmp.lt.s32.totalorder %s1408_s8, %s1408_s8 }
  0xd1   :  { %543 = vmatmul.mubr.bf16.vlgmr.msra.gmra.mrb[0].mxu1 %v150_v1  ;;  %1067 = vmatpush3.bf16.msra.mxu0 %v1215_v8  ;;  %p1415_p11 = por %p1414_p10, %p1413_p9 }
  0xd2   :  { %1068 = vmatprep.subr.bf16.mxu0 %v1216_v9  ;;  %1092 = vmatpush3.bf16.msra.mxu1 %v1224_v17 }
  0xd3   :  { %1093 = vmatprep.subr.bf16.mxu1 %v1455_v18  ;;  %1107 = vmatprep.mubr.msk.bf16.mxu1 %vm1456_vm2, %v1455_v18  ;;  %p1416_p12 = pnand %p1415_p11, %p1409_p8 }
  0xd5   :  { %1069 = vmatpush3.bf16.msra.mxu0 %v1217_v10 }
  0xd6   :  { %1070 = vmatprep.subr.bf16.mxu0 %v1218_v11  ;;  %1094 = vmatpush3.bf16.msra.mxu1 %v1225_v19 }
  0xd7   :  { %1095 = vmatprep.subr.bf16.mxu1 %v1455_v18 }
  0xd9   :  { %1071 = vmatpush3.bf16.msra.mxu0 %v1219_v12 }
  0xda   :  { %1072 = vmatprep.subr.bf16.mxu0 %v1220_v13  ;;  %1096 = vmatpush3.bf16.msra.mxu1 %v1226_v20 }
  0xdb   :  { %1097 = vmatprep.subr.bf16.mxu1 %v1455_v18 }
  0xdd   :  { %1073 = vmatpush3.bf16.msra.mxu0 %v1221_v14 }
  0xde   :  { %1074 = vmatprep.subr.bf16.mxu0 %v1222_v15  ;;  %1098 = vmatpush3.bf16.msra.mxu1 %v1227_v21 }
  0xdf   :  { %1099 = vmatprep.subr.bf16.mxu1 %v1455_v18 }
  0xe1   :  { %1075 = vmatpush3.bf16.msra.mxu0 %v1223_v16 }
  0xe2   :  { %1100 = vmatpush3.bf16.msra.mxu1 %v1228_v22 }
  0xe3   :  { %1101 = vmatprep.subr.bf16.mxu1 %v1455_v18 }
  0xe6   :  { %1102 = vmatpush3.bf16.msra.mxu1 %v1229_v23 }
  0xe7   :  { %1103 = vmatprep.subr.bf16.mxu1 %v1455_v18 }
  0xea   :  { %1104 = vmatpush3.bf16.msra.mxu1 %v1230_v59 }
  0xeb   :  { %1105 = vmatprep.subr.bf16.mxu1 %v1455_v18 }
  0xee   :  { %1106 = vmatpush3.bf16.msra.mxu1 %v1231_v60 }
 0x16f   :  { %v263_v24 = vpop.f32.mrb[0].mxu0 }
 0x170   :  { %v265_v25 = vpop.f32.mrb[1].mxu0 }
 0x171   :  { %v267_v26 = vpop.f32.mrb[2].mxu0 }
 0x172   :  { %v268_v27 = vpop.f32.mrb[3].mxu0 }
 0x18f   :  { %v585_v28 = vpop.f32.mrb[4].mxu0 }
 0x190   :  { %v587_v29 = vpop.f32.mrb[5].mxu0 }
 0x191   :  { %v589_v30 = vpop.f32.mrb[6].mxu0 }
 0x192   :  { %v590_v31 = vpop.f32.mrb[7].mxu0 }
 0x197   :  { %v642_v32 = vpop.f32.mrb[8].mxu0 }
 0x198   :  { %v644_v34 = vpop.f32.mrb[9].mxu0 }
 0x199   :  { %v646_v35 = vpop.f32.mrb[10].mxu0 }
 0x19a   :  { %v647_v36 = vpop.f32.mrb[11].mxu0 }
 0x1a4   :  { %v544_v39 = vpop.f32.mrb[0].mxu1 }
 0x1a5   :  { %v545_v42 = vadd.f32 %v544_v39, %v263_v24  ;;  %v546_v43 = vpop.f32.mrb[1].mxu1 }
 0x1a6   :  { %v547_v44 = vadd.f32 %v546_v43, %v265_v25  ;;  %v548_v45 = vpop.f32.mrb[2].mxu1 }
 0x1a7   :  { %v586_v46 = vadd.f32 %v585_v28, %v545_v42  ;;  %v549_v48 = vpop.f32.mrb[3].mxu1 }
 0x1a8   :  { %v588_v49 = vadd.f32 %v587_v29, %v547_v44 }
 0x1a9   :  { %v649_v51 = vadd.f32 %v642_v32, %v586_v46 }
 0x1aa   :  { %v650_v52 = vadd.f32 %v644_v34, %v588_v49 }
 0x1ab   :  { %v663_v53 = vadd.f32 %v656_v47, %v649_v51 }
 0x1ac   :  { %v664_v54 = vadd.f32 %v660_v50, %v650_v52 }
 0x1ad   :  { %v665_v55 = vmax.f32 %v663_v53, 0.0 }
 0x1ae   :  { %v666_v56 = vmax.f32 %v664_v54, 0.0 }
 0x1af   :  { %v667_v58 = vpack.c.bf16 %v665_v55, %v665_v55 }
 0x1b0   :  { %v668_v57 = vpack.c.bf16 %v666_v56, %v666_v56 }
 0x1b2   :  { %836 = vmatprep.mubr.bf16.mxu0 %v668_v57 }
 0x1b3   :  { %837 = vmatmul.mubr.bf16.vlgmr.msra.gmra.mrb[12].mxu0 %v667_v58 }
 0x286   :  { %v1076_v61 = vpop.f32.mrb[12].mxu0 }
 0x287   :  { %v1077_v63 = vpop.f32.mrb[13].mxu0 }
 0x288   :  { %v1078_v1 = vadd.f32 %v1077_v63, %v1076_v61  ;;  %v1079_v2 = vpop.f32.mrb[14].mxu0 }
 0x289   :  { %v1080_v3 = vpop.f32.mrb[15].mxu0 }
 0x28a   :  { %v839_v4 = vadd.f32 %v1078_v1, %v1034_v62 }
 0x28c   :  { %v844_v0 = vmax.f32 %v839_v4, 0.0 }
 0x28e   :  { %v845_v5 = vpack.c.bf16 %v844_v0, %v844_v0 }
 0x290   :  { %1108 = vmatmul.mubr.bf16.vlgmr.msra.gmra.mrb[4].mxu1 %v845_v5 }
 0x363   :  { %v951_v7 = vpop.f32.mrb[4].mxu1 }
 0x364   :  { %v952_v8 = vadd.f32 %v1051_v6, %v951_v7  ;;  %v1109_v9 = vpop.f32.mrb[5].mxu1 }
 0x365   :  { %v954_v10 = vpop.f32.mrb[6].mxu1 }
 0x366   :  { %v957_v11 = vmax.f32 %v952_v8, 0.0  ;;  %v1110_v12 = vpop.f32.mrb[7].mxu1 }
 0x368   :  { %958 = vst [vmem:[#allocation16] sm:$0xff] %v957_v11 }
 0x369   :  { %1419 = shalt.err (!%p1416_p12)
}
 0x36a   :  { %s1420_s10 = scalar_lea.hbm %s1672_s11, 128 }
 0x36b   :  { %p1421_p13 = scmp.ne.s32.totalorder %s1672_s11, %s1420_s10  ;;  %p1424_p0 = scmp.lt.u32.totalorder %s1420_s10, %s1672_s11 }
 0x36d   :  { %p1426_p1 = pnand %p1424_p0, %p1421_p13 }
 0x36f   :  { %1429 = shalt.err (!%p1426_p1)
}
 0x370   :  { %968 = dma.vmem_to_hbm [thread:$0]  %s966_s16, 128, %s1672_s11, [#allocation4]  }
 0x371   :  { %1440 = dma.done.wait [#allocation4], 128  }
 0x372   :  { %1441 = vsyncadd [#allocation4], 4294967168 }
 0x373   :  { %972 = vsyncpa [#allocation3], 1 }
 0x374   :  { %973 = vsyncpa [#allocation6], 1 }
 0x375   :  { %974 = vsyncpa [#allocation9], 1 }
 0x376   :  { %975 = vsyncpa [#allocation12], 1 }
 0x377   :  { %976 = vsyncpa [#allocation15], 1 }
 0x378   :  { %977 = vsyncpa [#allocation4], 1 }

</bundles_post_ra>
